<compile_context>
chip_gen: v7x
topology: tpu7x:2x2x1
jax: 0.10.0
libtpu: 0.0.40
codegen_flags: <defaults>
</compile_context>

<pallas_src>
import functools

import jax
import jax.numpy as jnp
from jax.experimental import pallas as pl
from jax.experimental.pallas import tpu as pltpu

IN_FEATURES = 28 * 28      # 784
HIDDEN = 100
OUT_FEATURES = 10

HID_PAD = 128              # hidden padded to one lane tile
OUT_STORE = 16             # logits stored at width 16 (10 classes + 6 pad)
NEG_BIG = -1e30            # bias on pad logit lanes -> exp() underflows to 0


def _cdiv(a, b):
    return (a + b - 1) // b


def _round_up(n, m):
    return _cdiv(n, m) * m


def _choose_tile(batch, tile_b_max):
    """Pick (tile_b, padded_batch). Tiles are multiples of 16 rows; the grid
    gets an even number of steps (>=2 when possible) for v7x megacore."""
    b16 = _round_up(batch, 16)
    if b16 <= tile_b_max:
        n_steps = 2 if b16 >= 32 else 1
    else:
        n_steps = _cdiv(b16, tile_b_max)
        n_steps += n_steps % 2          # even step count balances 2 TCs
    tile_b = _round_up(_cdiv(b16, n_steps), 16)
    return tile_b, tile_b * n_steps


def netfull_kernel(x_ref, w1_ref, b1_ref, w2_ref, b2_ref, o_ref):
    # x_ref:  (TB, 784) f32       w1_ref: (784, 128) bf16   b1_ref: (1, 128) f32
    # w2_ref: (128, 16) bf16      b2_ref: (1, 16)   f32     o_ref:  (TB, 16) f32
    # Linear 1: cast x to bf16 on the VPU (hidden under DMA), MXU matmul with
    # f32 accumulation, then bias + tanh in f32.
    x_bf16 = x_ref[...].astype(jnp.bfloat16)
    h = jnp.dot(x_bf16, w1_ref[...], preferred_element_type=jnp.float32)
    h = jnp.tanh(h + b1_ref[...])

    # Linear 2 (bf16 MXU, f32 accumulate). Pad lanes 10..15 get bias -1e30 so
    # they are excluded from the softmax; hidden pad rows of w2 are zero.
    logits = jnp.dot(h.astype(jnp.bfloat16), w2_ref[...],
                     preferred_element_type=jnp.float32) + b2_ref[...]

    # Numerically stable LogSoftmax over the class axis (width 16).
    m = jnp.max(logits, axis=-1, keepdims=True)
    z = logits - m
    lse = jnp.log(jnp.sum(jnp.exp(z), axis=-1, keepdims=True))
    o_ref[...] = (z - lse).astype(o_ref.dtype)


def prepare_params(w1, b1, w2, b2):
    """Pad params to kernel shapes; w1/w2 streamed as bf16. Done once."""
    w1p = (jnp.zeros((IN_FEATURES, HID_PAD), jnp.float32)
           .at[:, :HIDDEN].set(w1).astype(jnp.bfloat16))
    b1p = jnp.zeros((1, HID_PAD), jnp.float32).at[:, :HIDDEN].set(b1)
    w2p = (jnp.zeros((HID_PAD, OUT_STORE), jnp.float32)
           .at[:HIDDEN, :OUT_FEATURES].set(w2).astype(jnp.bfloat16))
    b2p = jnp.full((1, OUT_STORE), NEG_BIG, jnp.float32).at[:, :OUT_FEATURES].set(b2)
    return w1p, b1p, w2p, b2p


@functools.partial(jax.jit, static_argnames=("tile_b_max",))
def netfull_forward(x, w1p, b1p, w2p, b2p, *, tile_b_max=2048):
    """x: (B, 1, 28, 28) or (B, 784). Returns (B, 10) log-probabilities."""
    B = x.shape[0]
    x2d = x.reshape(B, IN_FEATURES)           # view-style reshape, no copy
    if x2d.dtype != jnp.float32:
        # TODO(synk): for uint8 MNIST pixels, keep uint8 across the boundary
        # and cast/scale on the VPU inside the kernel to quarter the HBM read.
        x2d = x2d.astype(jnp.float32)

    tile_b, b_pad = _choose_tile(B, tile_b_max)
    if b_pad != B:
        x2d = jnp.pad(x2d, ((0, b_pad - B), (0, 0)))

    out = pl.pallas_call(
        netfull_kernel,
        out_shape=jax.ShapeDtypeStruct((b_pad, OUT_STORE), jnp.float32),
        grid_spec=pltpu.PrefetchScalarGridSpec(
            num_scalar_prefetch=0,
            grid=(b_pad // tile_b,),
            in_specs=[
                # x tile: last block dim == full array dim (784) is legal.
                pl.BlockSpec((tile_b, IN_FEATURES), lambda i: (i, 0)),
                pl.BlockSpec((IN_FEATURES, HID_PAD), lambda i: (0, 0)),  # w1 resident
                pl.BlockSpec((1, HID_PAD), lambda i: (0, 0)),            # b1 resident
                pl.BlockSpec((HID_PAD, OUT_STORE), lambda i: (0, 0)),    # w2 resident
                pl.BlockSpec((1, OUT_STORE), lambda i: (0, 0)),          # b2 resident
            ],
            out_specs=pl.BlockSpec((tile_b, OUT_STORE), lambda i: (i, 0)),
        ),
        compiler_params=pltpu.CompilerParams(
            dimension_semantics=("parallel",),
            vmem_limit_bytes=32 * 1024 * 1024),
    )(x2d, w1p, b1p, w2p, b2p)

    return out[:B, :OUT_FEATURES]


def init_params(key):
    """Deterministic init mimicking nn.Linear's U(-1/sqrt(fan_in), 1/sqrt(fan_in))."""
    k1, k2, k3, k4 = jax.random.split(key, 4)
    bound1 = 1.0 / jnp.sqrt(jnp.float32(IN_FEATURES))
    bound2 = 1.0 / jnp.sqrt(jnp.float32(HIDDEN))
    # Stored as (in, out) so the kernel does x @ W (== PyTorch x @ W^T).
    w1 = jax.random.uniform(k1, (IN_FEATURES, HIDDEN), jnp.float32, -bound1, bound1)
    b1 = jax.random.uniform(k2, (1, HIDDEN), jnp.float32, -bound1, bound1)
    w2 = jax.random.uniform(k3, (HIDDEN, OUT_FEATURES), jnp.float32, -bound2, bound2)
    b2 = jax.random.uniform(k4, (1, OUT_FEATURES), jnp.float32, -bound2, bound2)
    return w1, b1, w2, b2


def netfull_reference(x, w1, b1, w2, b2):
    x2d = x.reshape(x.shape[0], -1).astype(jnp.float32)
    h = jnp.tanh(x2d @ w1 + b1)
    logits = h @ w2 + b2
    return jax.nn.log_softmax(logits, axis=-1)


if __name__ == "__main__":
    key = jax.random.PRNGKey(0)
    kx, kp = jax.random.split(key)

    B = 8
    x = jax.random.normal(kx, (B, 1, 28, 28), jnp.float32)  # NCHW, like MNIST input
    w1, b1, w2, b2 = init_params(kp)
    w1p, b1p, w2p, b2p = prepare_params(w1, b1, w2, b2)

    out = netfull_forward(x, w1p, b1p, w2p, b2p)
    out = jax.block_until_ready(out)

    ref = netfull_reference(x, w1, b1, w2, b2)
    assert out.shape == (B, OUT_FEATURES)
    # bf16 MXU streaming of x/w1/w2 loosens agreement vs the pure-f32 reference.
    assert jnp.allclose(out, ref, atol=3e-2, rtol=3e-2), "mismatch vs pure-JAX reference"
    # log-softmax sanity: each row's probabilities sum to 1.
    assert jnp.allclose(jnp.sum(jnp.exp(out), axis=-1), 1.0, atol=1e-3)

    print("KERNEL_OK")
</pallas_src>

<mosaic_0001>
module attributes {stable_mosaic.version = 11 : i64} {
  func.func @netfull_kernel(%arg0: i32, %arg1: memref<16x784xf32, #tpu.memory_space<vmem>>, %arg2: memref<784x128xbf16, #tpu.memory_space<vmem>>, %arg3: memref<1x128xf32, #tpu.memory_space<vmem>>, %arg4: memref<128x16xbf16, #tpu.memory_space<vmem>>, %arg5: memref<1x16xf32, #tpu.memory_space<vmem>>, %arg6: memref<16x16xf32, #tpu.memory_space<vmem>>) attributes {dimension_semantics = [#tpu.dimension_semantics<parallel>], iteration_bounds = array<i64: 1>, scalar_prefetch = 0 : i64, scratch_operands = 0 : i64, tpu.core_type = #tpu.core_type<tc>, window_params = [{transform_indices = @transform_0, window_bounds = array<i64: 16, 784>}, {pipeline_mode = #tpu.pipeline_mode<synchronous>, transform_indices = @transform_1, window_bounds = array<i64: 784, 128>}, {pipeline_mode = #tpu.pipeline_mode<synchronous>, transform_indices = @transform_2, window_bounds = array<i64: 1, 128>}, {pipeline_mode = #tpu.pipeline_mode<synchronous>, transform_indices = @transform_3, window_bounds = array<i64: 128, 16>}, {pipeline_mode = #tpu.pipeline_mode<synchronous>, transform_indices = @transform_4, window_bounds = array<i64: 1, 16>}, {transform_indices = @transform_5, window_bounds = array<i64: 16, 16>}]} {
    %c0 = arith.constant 0 : index
    %c0_0 = arith.constant 0 : index
    %0 = vector.load %arg1[%c0, %c0_0] : memref<16x784xf32, #tpu.memory_space<vmem>>, vector<16x784xf32>
    %1 = arith.truncf %0 : vector<16x784xf32> to vector<16x784xbf16>
    %c0_1 = arith.constant 0 : index
    %c0_2 = arith.constant 0 : index
    %2 = vector.load %arg2[%c0_1, %c0_2] : memref<784x128xbf16, #tpu.memory_space<vmem>>, vector<784x128xbf16>
    %cst = arith.constant dense<0.000000e+00> : vector<16x128xf32>
    %3 = tpu.matmul %1, %2, %cst {dimension_numbers = #tpu.dot_dimension_numbers<[1], [0], [0], [1], [0, 0, 1, 1], [], []>} : vector<16x784xbf16>, vector<784x128xbf16>, vector<16x128xf32> -> vector<16x128xf32>
    %c0_3 = arith.constant 0 : index
    %c0_4 = arith.constant 0 : index
    %4 = vector.load %arg3[%c0_3, %c0_4] : memref<1x128xf32, #tpu.memory_space<vmem>>, vector<1x128xf32>
    %5 = vector.broadcast %4 : vector<1x128xf32> to vector<16x128xf32>
    %6 = arith.addf %3, %5 : vector<16x128xf32>
    %7 = math.tanh %6 : vector<16x128xf32>
    %8 = arith.truncf %7 : vector<16x128xf32> to vector<16x128xbf16>
    %c0_5 = arith.constant 0 : index
    %c0_6 = arith.constant 0 : index
    %9 = vector.load %arg4[%c0_5, %c0_6] : memref<128x16xbf16, #tpu.memory_space<vmem>>, vector<128x16xbf16>
    %cst_7 = arith.constant dense<0.000000e+00> : vector<16x16xf32>
    %10 = tpu.matmul %8, %9, %cst_7 {dimension_numbers = #tpu.dot_dimension_numbers<[1], [0], [0], [1], [0, 0, 1, 1], [], []>} : vector<16x128xbf16>, vector<128x16xbf16>, vector<16x16xf32> -> vector<16x16xf32>
    %c0_8 = arith.constant 0 : index
    %c0_9 = arith.constant 0 : index
    %11 = vector.load %arg5[%c0_8, %c0_9] : memref<1x16xf32, #tpu.memory_space<vmem>>, vector<1x16xf32>
    %12 = vector.broadcast %11 : vector<1x16xf32> to vector<16x16xf32>
    %13 = arith.addf %10, %12 : vector<16x16xf32>
    %cst_10 = arith.constant dense<0xFF800000> : vector<16xf32>
    %14 = vector.multi_reduction <maximumf>, %13, %cst_10 [1] : vector<16x16xf32> to vector<16xf32>
    %15 = vector.shape_cast %14 : vector<16xf32> to vector<16x1xf32>
    %16 = vector.broadcast %15 : vector<16x1xf32> to vector<16x16xf32>
    %17 = arith.subf %13, %16 : vector<16x16xf32>
    %18 = math.exp %17 : vector<16x16xf32>
    %cst_11 = arith.constant dense<0.000000e+00> : vector<16xf32>
    %19 = vector.multi_reduction <add>, %18, %cst_11 [1] : vector<16x16xf32> to vector<16xf32>
    %20 = vector.shape_cast %19 : vector<16xf32> to vector<16x1xf32>
    %21 = math.log %20 : vector<16x1xf32>
    %22 = vector.broadcast %21 : vector<16x1xf32> to vector<16x16xf32>
    %23 = arith.subf %17, %22 : vector<16x16xf32>
    %c0_12 = arith.constant 0 : index
    %c0_13 = arith.constant 0 : index
    %24 = vector.load %arg6[%c0_12, %c0_13] : memref<16x16xf32, #tpu.memory_space<vmem>>, vector<16x16xf32>
    tpu.vector_store %arg6[%c0_12, %c0_13], %23 {strides = array<i32>} : memref<16x16xf32, #tpu.memory_space<vmem>>, vector<16x16xf32>,
    return
  }
  func.func @transform_0(%arg0: i32) -> (i32, i32) {
    %c0_i32 = arith.constant 0 : i32
    %c0_i32_0 = arith.constant 0 : i32
    return %arg0, %c0_i32 : i32, i32
  }
  func.func @transform_1(%arg0: i32) -> (i32, i32) {
    %c0_i32 = arith.constant 0 : i32
    %c0_i32_0 = arith.constant 0 : i32
    %c0_i32_1 = arith.constant 0 : i32
    return %c0_i32, %c0_i32_0 : i32, i32
  }
  func.func @transform_2(%arg0: i32) -> (i32, i32) {
    %c0_i32 = arith.constant 0 : i32
    %c0_i32_0 = arith.constant 0 : i32
    %c0_i32_1 = arith.constant 0 : i32
    return %c0_i32, %c0_i32_0 : i32, i32
  }
  func.func @transform_3(%arg0: i32) -> (i32, i32) {
    %c0_i32 = arith.constant 0 : i32
    %c0_i32_0 = arith.constant 0 : i32
    %c0_i32_1 = arith.constant 0 : i32
    return %c0_i32, %c0_i32_0 : i32, i32
  }
  func.func @transform_4(%arg0: i32) -> (i32, i32) {
    %c0_i32 = arith.constant 0 : i32
    %c0_i32_0 = arith.constant 0 : i32
    %c0_i32_1 = arith.constant 0 : i32
    return %c0_i32, %c0_i32_0 : i32, i32
  }
  func.func @transform_5(%arg0: i32) -> (i32, i32) {
    %c0_i32 = arith.constant 0 : i32
    %c0_i32_0 = arith.constant 0 : i32
    return %arg0, %c0_i32 : i32, i32
  }
}

</mosaic_0001>

<bundles_post_ra>
// kernel: netfull_forward.1
= control target key start
LH: loop header
LB: loop body
LE: loop exit
PB: predicated region body
PF: predicated region fallthrough
CT: control target
= control target key end

     0   :  { %v988_v43 = vmov 0.0   ;;  %vm989_vm0 = vmmov 0   ;;  %vm441_vm1 = vcmask 130048   ;;  %s1265_s1 = inlined_call_operand.vmem [shape: bf16[784,128], index: 1, kind: input, shape index: {}]   ;;  %s1266_s0 = inlined_call_operand.vmem [shape: f32[16,784], index: 0, kind: input, shape index: {}]   ;;  %s1267_s3 = inlined_call_operand.vmem [shape: bf16[128,16], index: 3, kind: input, shape index: {}]   ;;  %s1268_s2 = inlined_call_operand.vmem [shape: f32[1,128], index: 2, kind: input, shape index: {}]   ;;  %s1269_s4 = inlined_call_operand.vmem [shape: f32[1,16], index: 4, kind: input, shape index: {}]   ;;  %s1270_s5 = inlined_call_operand.vmem [shape: f32[16,16], index: 5, kind: output, shape index: {}]  }
   0x1   :  { %v919_v0 = vld [vmem:[%s1265_s1 + $0x40] sm:$0xff]   ;;  %v923_v4 = vld [vmem:[%s1265_s1 + $0x48] sm:$0xff]   ;;  %v927_v8 = vld [vmem:[%s1265_s1 + $0x50] sm:$0xff]  }
   0x2   :  { %v920_v1 = vld [vmem:[%s1265_s1] sm:$0xff]   ;;  %814 = vmatprep.subr.bf16.mxu0 %v919_v0  ;;  %v924_v5 = vld [vmem:[%s1265_s1 + $0x8] sm:$0xff]   ;;  %v928_v9 = vld [vmem:[%s1265_s1 + $0x10] sm:$0xff]  }
   0x3   :  { %v921_v2 = vld [vmem:[%s1265_s1 + $0xc0] sm:$0xff]   ;;  %815 = vmatpush3.bf16.msra.mxu0 %v920_v1  ;;  %v925_v6 = vld [vmem:[%s1265_s1 + $0xc8] sm:$0xff]   ;;  %v929_v10 = vld [vmem:[%s1265_s1 + $0xd0] sm:$0xff]  }
   0x4   :  { %v922_v3 = vld [vmem:[%s1265_s1 + $0x80] sm:$0xff]   ;;  %836 = vmatprep.subr.bf16.mxu1 %v921_v2  ;;  %816 = vmatprep.subr.bf16.mxu0 %v923_v4  ;;  %v926_v7 = vld [vmem:[%s1265_s1 + $0x88] sm:$0xff]   ;;  %v930_v11 = vld [vmem:[%s1265_s1 + $0x90] sm:$0xff]  }
   0x5   :  { %837 = vmatpush3.bf16.msra.mxu1 %v922_v3  ;;  %v931_v12 = vld [vmem:[%s1265_s1 + $0x58] sm:$0xff]   ;;  %v935_v16 = vld [vmem:[%s1265_s1 + $0x60] sm:$0xff]   ;;  %v939_v20 = vld [vmem:[%s1265_s1 + $0x68] sm:$0xff]  }
   0x6   :  { %838 = vmatprep.subr.bf16.mxu1 %v925_v6  ;;  %v932_v13 = vld [vmem:[%s1265_s1 + $0x18] sm:$0xff]   ;;  %v936_v17 = vld [vmem:[%s1265_s1 + $0x20] sm:$0xff]   ;;  %v940_v21 = vld [vmem:[%s1265_s1 + $0x28] sm:$0xff]  }
   0x7   :  { %817 = vmatpush3.bf16.msra.mxu0 %v924_v5  ;;  %v933_v14 = vld [vmem:[%s1265_s1 + $0xd8] sm:$0xff]   ;;  %v937_v18 = vld [vmem:[%s1265_s1 + $0xe0] sm:$0xff]   ;;  %v941_v22 = vld [vmem:[%s1265_s1 + $0xe8] sm:$0xff]  }
   0x8   :  { %818 = vmatprep.subr.bf16.mxu0 %v927_v8  ;;  %v934_v15 = vld [vmem:[%s1265_s1 + $0x98] sm:$0xff]   ;;  %v938_v19 = vld [vmem:[%s1265_s1 + $0xa0] sm:$0xff]   ;;  %v942_v23 = vld [vmem:[%s1265_s1 + $0xa8] sm:$0xff]  }
   0x9   :  { %839 = vmatpush3.bf16.msra.mxu1 %v926_v7  ;;  %v943_v24 = vld [vmem:[%s1265_s1 + $0x70] sm:$0xff]   ;;  %v947_v28 = vld [vmem:[%s1265_s1 + $0x78] sm:$0xff]   ;;  %v22_v31 = vld [vmem:[%s1266_s0 + $0x8] sm:$0xff] }
   0xa   :  { %840 = vmatprep.subr.bf16.mxu1 %v929_v10  ;;  %v944_v25 = vld [vmem:[%s1265_s1 + $0x30] sm:$0xff]   ;;  %v948_v29 = vld [vmem:[%s1265_s1 + $0x38] sm:$0xff]   ;;  %v29_v32 = vld [vmem:[%s1266_s0 + $0x40] sm:$0xff] }
   0xb   :  { %819 = vmatpush3.bf16.msra.mxu0 %v928_v9  ;;  %v945_v26 = vld [vmem:[%s1265_s1 + $0xf0] sm:$0xff]   ;;  %v949_v30 = vld [vmem:[%s1265_s1 + $0xf8] sm:$0xff]   ;;  %v36_v33 = vpack.c.bf16 %v29_v32, %v22_v31  ;;  %v21_v35 = vld [vmem:[%s1266_s0] sm:$0xff] }
   0xc   :  { %820 = vmatprep.subr.bf16.mxu0 %v931_v12  ;;  %v946_v27 = vld [vmem:[%s1265_s1 + $0xb0] sm:$0xff]   ;;  %v950_v34 = vld [vmem:[%s1265_s1 + $0xb8] sm:$0xff]   ;;  %v951_v38 = vld [vmem:[%s1265_s1 + $0x140] sm:$0xff]  }
   0xd   :  { %841 = vmatpush3.bf16.msra.mxu1 %v930_v11  ;;  %v28_v36 = vld [vmem:[%s1266_s0 + $0x38] sm:$0xff]  ;;  %477 = vmatprep.mubr.bf16.mxu0 %v36_v33  ;;  %v31_v40 = vld [vmem:[%s1266_s0 + $0x50] sm:$0xff]  ;;  %v952_v42 = vld [vmem:[%s1265_s1 + $0x100] sm:$0xff]  }
   0xe   :  { %842 = vmatprep.subr.bf16.mxu1 %v933_v14  ;;  %v35_v37 = vpack.c.bf16 %v28_v36, %v21_v35  ;;  %v24_v39 = vld [vmem:[%s1266_s0 + $0x18] sm:$0xff]  ;;  %v23_v44 = vld [vmem:[%s1266_s0 + $0x10] sm:$0xff]  ;;  %v30_v45 = vld [vmem:[%s1266_s0 + $0x48] sm:$0xff] }
   0xf   :  { %821 = vmatpush3.bf16.msra.mxu0 %v932_v13  ;;  %v38_v41 = vpack.c.bf16 %v31_v40, %v24_v39  ;;  %v37_v46 = vpack.c.bf16 %v30_v45, %v23_v44  ;;  %v953_v47 = vld [vmem:[%s1265_s1 + $0x148] sm:$0xff]   ;;  %v955_v49 = vld [vmem:[%s1265_s1 + $0x150] sm:$0xff]   ;;  %v957_v51 = vld [vmem:[%s1265_s1 + $0x158] sm:$0xff]  }
  0x10   :  { %822 = vmatprep.subr.bf16.mxu0 %v935_v16  ;;  %v954_v48 = vld [vmem:[%s1265_s1 + $0x108] sm:$0xff]   ;;  %v956_v50 = vld [vmem:[%s1265_s1 + $0x110] sm:$0xff]   ;;  %v958_v52 = vld [vmem:[%s1265_s1 + $0x118] sm:$0xff]  }
  0x11   :  { %843 = vmatpush3.bf16.msra.mxu1 %v934_v15  ;;  %518 = vmatprep.mubr.bf16.mxu1 %v38_v41  ;;  %v959_v53 = vld [vmem:[%s1265_s1 + $0x160] sm:$0xff]   ;;  %v961_v55 = vld [vmem:[%s1265_s1 + $0x168] sm:$0xff]   ;;  %v27_v61 = vld [vmem:[%s1266_s0 + $0x30] sm:$0xff] }
  0x12   :  { %844 = vmatprep.subr.bf16.mxu1 %v937_v18  ;;  %v960_v54 = vld [vmem:[%s1265_s1 + $0x120] sm:$0xff]   ;;  %v26_v57 = vld [vmem:[%s1266_s0 + $0x28] sm:$0xff]  ;;  %v963_v63 = vld [vmem:[%s1265_s1 + $0x170] sm:$0xff]  }
  0x13   :  { %823 = vmatpush3.bf16.msra.mxu0 %v936_v17  ;;  %v967_v56 = vld [vmem:[%s1265_s1 + $0x180] sm:$0xff]   ;;  %v962_v59 = vld [vmem:[%s1265_s1 + $0x128] sm:$0xff]   ;;  %v964_v1 = vld [vmem:[%s1265_s1 + $0x130] sm:$0xff]  }
  0x14   :  { %824 = vmatprep.subr.bf16.mxu0 %v939_v20  ;;  %v33_v58 = vld [vmem:[%s1266_s0 + $0x60] sm:$0xff]  ;;  %v34_v62 = vld [vmem:[%s1266_s0 + $0x68] sm:$0xff]  ;;  %v965_v2 = vld [vmem:[%s1265_s1 + $0x178] sm:$0xff]  }
  0x15   :  { %845 = vmatpush3.bf16.msra.mxu1 %v938_v19  ;;  %v40_v60 = vpack.c.bf16 %v33_v58, %v26_v57  ;;  %v41_v0 = vpack.c.bf16 %v34_v62, %v27_v61  ;;  %v966_v3 = vld [vmem:[%s1265_s1 + $0x138] sm:$0xff]   ;;  %v25_v4 = vld [vmem:[%s1266_s0 + $0x20] sm:$0xff]  ;;  %v969_v8 = vld [vmem:[%s1267_s3 + $0x8] sm:$0xff]  }
  0x16   :  { %846 = vmatprep.subr.bf16.mxu1 %v941_v22  ;;  %v32_v5 = vld [vmem:[%s1266_s0 + $0x58] sm:$0xff]  ;;  %v968_v7 = vld [vmem:[%s1267_s3] sm:$0xff]   ;;  %v970_v9 = vld [vmem:[%s1267_s3 + $0x10] sm:$0xff]  }
  0x17   :  { %825 = vmatpush3.bf16.msra.mxu0 %v940_v21  ;;  %v39_v6 = vpack.c.bf16 %v32_v5, %v25_v4  ;;  %v971_v10 = vld [vmem:[%s1267_s3 + $0x18] sm:$0xff]   ;;  %v972_v11 = vld [vmem:[%s1267_s3 + $0x20] sm:$0xff]   ;;  %v973_v12 = vld [vmem:[%s1267_s3 + $0x28] sm:$0xff]  }
  0x18   :  { %826 = vmatprep.subr.bf16.mxu0 %v943_v24  ;;  %v974_v13 = vld [vmem:[%s1267_s3 + $0x30] sm:$0xff]   ;;  %v975_v14 = vld [vmem:[%s1267_s3 + $0x38] sm:$0xff]   ;;  %v754_v16 = vld [vmem:[%s1268_s2] ss:$0 sm:$0xff] }
  0x19   :  { %847 = vmatpush3.bf16.msra.mxu1 %v942_v23 }
  0x1a   :  { %848 = vmatprep.subr.bf16.mxu1 %v945_v26 }
  0x1b   :  { %827 = vmatpush3.bf16.msra.mxu0 %v944_v25 }
  0x1c   :  { %828 = vmatprep.subr.bf16.mxu0 %v947_v28 }
  0x1d   :  { %849 = vmatpush3.bf16.msra.mxu1 %v946_v27 }
  0x1e   :  { %850 = vmatprep.subr.bf16.mxu1 %v949_v30 }
  0x1f   :  { %829 = vmatpush3.bf16.msra.mxu0 %v948_v29 }
  0x20   :  { %858 = vmatprep.subr.bf16.mxu0 %v951_v38 }
  0x21   :  { %851 = vmatpush3.bf16.msra.mxu1 %v950_v34 }
  0x22   :  { %891 = vmatprep.subr.bf16.mxu1 %v988_v43  ;;  %478 = vmatmul.mubr.bf16.vlgmr.msra.gmra.mrb[0].mxu0 %v35_v37 }
  0x23   :  { %859 = vmatpush3.bf16.msra.mxu0 %v952_v42  ;;  %559 = vmatprep.mubr.bf16.mxu0 %v40_v60 }
  0x24   :  { %519 = vmatmul.mubr.bf16.vlgmr.msra.gmra.mrb[0].mxu1 %v37_v46  ;;  %860 = vmatprep.subr.bf16.mxu0 %v953_v47 }
  0x25   :  { %893 = vmatprep.mubr.msk.bf16.mxu1 %vm989_vm0, %v988_v43  ;;  %892 = vmatpush3.bf16.msra.mxu1 %v967_v56 }
  0x26   :  { %897 = vmatprep.subr.bf16.mxu1 %v988_v43 }
  0x27   :  { %861 = vmatpush3.bf16.msra.mxu0 %v954_v48 }
  0x28   :  { %862 = vmatprep.subr.bf16.mxu0 %v955_v49  ;;  %v805_v49 = vld [vmem:[%s1269_s4] ss:$0 sm:$0xff] }
  0x2b   :  { %863 = vmatpush3.bf16.msra.mxu0 %v956_v50 }
  0x2c   :  { %864 = vmatprep.subr.bf16.mxu0 %v957_v51  ;;  %894 = vmatmul.mubr.msk.bf16.vlgmr.msra.gmra.mrb[4].mxu1 %vm441_vm1, %v41_v0 }
  0x2d   :  { %913 = vmatprep.mubr.msk.bf16.mxu1 %vm989_vm0, %v988_v43  ;;  %898 = vmatpush3.bf16.msra.mxu1 %v968_v7 }
  0x2e   :  { %899 = vmatprep.subr.bf16.mxu1 %v988_v43 }
  0x2f   :  { %865 = vmatpush3.bf16.msra.mxu0 %v958_v52 }
  0x30   :  { %866 = vmatprep.subr.bf16.mxu0 %v959_v53 }
  0x31   :  { %900 = vmatpush3.bf16.msra.mxu1 %v969_v8 }
  0x32   :  { %901 = vmatprep.subr.bf16.mxu1 %v988_v43 }
  0x33   :  { %867 = vmatpush3.bf16.msra.mxu0 %v960_v54 }
  0x34   :  { %868 = vmatprep.subr.bf16.mxu0 %v961_v55 }
  0x35   :  { %902 = vmatpush3.bf16.msra.mxu1 %v970_v9 }
  0x36   :  { %903 = vmatprep.subr.bf16.mxu1 %v988_v43 }
  0x37   :  { %869 = vmatpush3.bf16.msra.mxu0 %v962_v59 }
  0x38   :  { %870 = vmatprep.subr.bf16.mxu0 %v963_v63 }
  0x39   :  { %904 = vmatpush3.bf16.msra.mxu1 %v971_v10 }
  0x3a   :  { %905 = vmatprep.subr.bf16.mxu1 %v988_v43 }
  0x3b   :  { %871 = vmatpush3.bf16.msra.mxu0 %v964_v1 }
  0x3c   :  { %872 = vmatprep.subr.bf16.mxu0 %v965_v2 }
  0x3d   :  { %906 = vmatpush3.bf16.msra.mxu1 %v972_v11 }
  0x3e   :  { %907 = vmatprep.subr.bf16.mxu1 %v988_v43 }
  0x3f   :  { %873 = vmatpush3.bf16.msra.mxu0 %v966_v3 }
  0x41   :  { %908 = vmatpush3.bf16.msra.mxu1 %v973_v12 }
  0x42   :  { %560 = vmatmul.mubr.bf16.vlgmr.msra.gmra.mrb[4].mxu0 %v39_v6  ;;  %909 = vmatprep.subr.bf16.mxu1 %v988_v43 }
  0x45   :  { %910 = vmatpush3.bf16.msra.mxu1 %v974_v13 }
  0x46   :  { %911 = vmatprep.subr.bf16.mxu1 %v988_v43 }
  0x49   :  { %912 = vmatpush3.bf16.msra.mxu1 %v975_v14 }
  0xf5   :  { %v830_v15 = vpop.f32.mrb[0].mxu0 }
  0xf6   :  { %v831_v17 = vpop.f32.mrb[1].mxu0 }
  0xf7   :  { %v832_v18 = vadd.f32 %v831_v17, %v830_v15  ;;  %v833_v19 = vpop.f32.mrb[2].mxu0  ;;  %v852_v20 = vpop.f32.mrb[0].mxu1 }
  0xf8   :  { %v834_v21 = vpop.f32.mrb[3].mxu0  ;;  %v853_v24 = vpop.f32.mrb[1].mxu1 }
  0xf9   :  { %v480_v22 = vadd.f32 %v832_v18, %v754_v16  ;;  %v835_v23 = vadd.f32 %v834_v21, %v833_v19  ;;  %v854_v25 = vadd.f32 %v853_v24, %v852_v20  ;;  %v855_v26 = vpop.f32.mrb[2].mxu1 }
  0xfa   :  { %v856_v28 = vpop.f32.mrb[3].mxu1 }
  0xfb   :  { %v483_v27 = vadd.f32 %v835_v23, %v754_v16  ;;  %v521_v29 = vadd.f32 %v854_v25, %v480_v22  ;;  %v857_v30 = vadd.f32 %v856_v28, %v855_v26 }
  0xfd   :  { %v524_v31 = vadd.f32 %v857_v30, %v483_v27 }
  0xff   :  { %v602_v32 = vpop.f32.mrb[4].mxu1 }
 0x100   :  { %v895_v33 = vpop.f32.mrb[5].mxu1 }
 0x101   :  { %v605_v34 = vpop.f32.mrb[6].mxu1 }
 0x102   :  { %v896_v35 = vpop.f32.mrb[7].mxu1 }
 0x115   :  { %v874_v36 = vpop.f32.mrb[4].mxu0 }
 0x116   :  { %v875_v37 = vpop.f32.mrb[5].mxu0 }
 0x117   :  { %v876_v38 = vadd.f32 %v875_v37, %v874_v36  ;;  %v877_v39 = vpop.f32.mrb[6].mxu0 }
 0x118   :  { %v878_v40 = vpop.f32.mrb[7].mxu0 }
 0x119   :  { %v562_v41 = vadd.f32 %v876_v38, %v521_v29  ;;  %v879_v42 = vadd.f32 %v878_v40, %v877_v39 }
 0x11b   :  { %v603_v43 = vadd.f32 %v602_v32, %v562_v41  ;;  %v565_v44 = vadd.f32 %v879_v42, %v524_v31 }
 0x11d   :  { %v606_v45 = vadd.f32 %v605_v34, %v565_v44  ;;  %976 = vtanh.f32 %v603_v43 }
 0x11f   :  { %978 = vtanh.f32 %v606_v45 }
 0x127   :  { %v977_v46 = vpop.eup %976 }
 0x129   :  { %v979_v47 = vpop.eup %978 }
 0x12a   :  { %v611_v48 = vpack.c.bf16 %v979_v47, %v977_v46 }
 0x12c   :  { %914 = vmatmul.mubr.bf16.vlgmr.msra.gmra.mrb[8].mxu1 %v611_v48 }
 0x1ff   :  { %v717_v50 = vpop.f32.mrb[8].mxu1 }
 0x200   :  { %v718_v51 = vadd.f32 %v805_v49, %v717_v50  ;;  %v915_v52 = vpop.f32.mrb[9].mxu1 }
 0x201   :  { %v720_v53 = vpop.f32.mrb[10].mxu1 }
 0x202   :  { %v721_v54 = vadd.f32 %v805_v49, %v720_v53  ;;  %v916_v55 = vpop.f32.mrb[11].mxu1  ;;  %v724_v56 = vsel %vm441_vm1, %v718_v51, -inf }
 0x203   :  { %725 = vmax.xlane.f32.xlu0 %v724_v56 }
 0x204   :  { %v727_v57 = vsel %vm441_vm1, %v721_v54, -inf }
 0x207   :  { %728 = vmax.xlane.f32.xlu0 %v727_v57 }
 0x290   :  { %v726_v58 = vpop.xlane.xlu0 %725 }
 0x291   :  { %v730_v59 = vsub.f32 %v718_v51, %v726_v58 }
 0x293   :  { %v732_v60 = vmul.f32 1.442695, %v730_v59 }
 0x294   :  { %v729_v61 = vpop.xlane.xlu0 %728 }
 0x295   :  { %980 = vpow2.f32 %v732_v60  ;;  %v731_v62 = vsub.f32 %v721_v54, %v729_v61 }
 0x297   :  { %v734_v63 = vmul.f32 1.442695, %v731_v62 }
 0x299   :  { %982 = vpow2.f32 %v734_v63 }
 0x29f   :  { %v981_v0 = vpop.eup %980 }
 0x2a0   :  { %v736_v1 = vsel %vm441_vm1, %v981_v0, 0.0 }
 0x2a1   :  { %737 = vadd.xlane.f32.xlu1 %v736_v1 }
 0x2a3   :  { %v983_v2 = vpop.eup %982 }
 0x2a4   :  { %v739_v3 = vsel %vm441_vm1, %v983_v2, 0.0 }
 0x2a5   :  { %740 = vadd.xlane.f32.xlu1 %v739_v3 }
 0x32e   :  { %v738_v4 = vpop.xlane.xlu1 %737 }
 0x32f   :  { %984 = vlog2.f32 %v738_v4 }
 0x332   :  { %v741_v5 = vpop.xlane.xlu1 %740 }
 0x333   :  { %986 = vlog2.f32 %v741_v5 }
 0x339   :  { %v985_v6 = vpop.eup %984 }
 0x33a   :  { %v743_v7 = vmul.f32 0.6931472, %v985_v6 }
 0x33c   :  { %v746_v8 = vsub.f32 %v730_v59, %v743_v7 }
 0x33d   :  { %v987_v9 = vpop.eup %986 }
 0x33e   :  { %748 = vst.msk [vmem:[%s1270_s5] sm:$0xff] %vm441_vm1, %v746_v8  ;;  %v745_v10 = vmul.f32 0.6931472, %v987_v9 }
 0x340   :  { %v747_v11 = vsub.f32 %v731_v62, %v745_v10 }
 0x342   :  { %749 = vst.msk [vmem:[%s1270_s5 + $0x8] sm:$0xff] %vm441_vm1, %v747_v11 }

</bundles_post_ra>
